<compile_context>
chip_gen: v5e
topology: v5e:2x2
jax: 0.10.0
libtpu: 0.0.40
codegen_flags: <defaults>
</compile_context>

<pallas_src>
import math
import jax
import jax.numpy as jnp
import numpy as np
from jax.experimental import pallas as pl
from jax.experimental.pallas import tpu as pltpu

_LANES = 128
_MAX_BLOCK_BYTES = 4 * 1024 * 1024        # 4 MiB per array per block
_VMEM_LIMIT_BYTES = 32 * 1024 * 1024      # 2 bufs x (in + out) x 4 MiB = 16 MiB, 2x headroom


def _gelu_kernel(x_ref, o_ref):
    # Lane-dense (block_rows, 128) tile -> full-width unmasked vst on interior blocks.
    # Always compute in f32 (safe on v5e, matches PyTorch erf-GELU numerics).
    x = x_ref[...].astype(jnp.float32)
    half_x = x * 0.5
    y = half_x + half_x * jax.lax.erf(x * 0.7071067811865476)
    o_ref[...] = y.astype(o_ref.dtype)


def _sublane_multiple(dtype):
    # Minimum second-to-last tile dim: f32 -> 8, bf16/f16 -> 16, int8/fp8 -> 32.
    itemsize = jnp.dtype(dtype).itemsize
    return max(8, 8 * (4 // itemsize))


def gelu(x):
    """Exact (erf-form) GELU via a single lane-dense Pallas TPU kernel."""
    orig_shape = x.shape
    dtype = x.dtype
    itemsize = jnp.dtype(dtype).itemsize
    n = int(np.prod(orig_shape)) if len(orig_shape) else 1

    flat = x.reshape(-1)

    # Only pad (one extra HBM copy) in the uncommon case n % 128 != 0; ragged
    # row-blocks are handled by Pallas's masked edge writes.
    padded = (n % _LANES) != 0
    if padded:
        n_pad = ((n + _LANES - 1) // _LANES) * _LANES
        flat = jnp.pad(flat, (0, n_pad - n))
    else:
        n_pad = n
    rows = n_pad // _LANES
    x2d = flat.reshape(rows, _LANES)

    sub = _sublane_multiple(dtype)
    max_block_rows = max(sub, _MAX_BLOCK_BYTES // (_LANES * itemsize))
    # Keep >= 2 grid steps when possible so both v7x TensorCores get work.
    half_rows = ((pl.cdiv(rows, 2) + sub - 1) // sub) * sub
    block_rows = max(sub, min(max_block_rows, half_rows))
    grid = pl.cdiv(rows, block_rows)

    cost = pl.CostEstimate(
        flops=5 * n,
        transcendentals=n,
        bytes_accessed=2 * n * itemsize,
    )

    out2d = pl.pallas_call(
        _gelu_kernel,
        grid=(grid,),
        in_specs=[pl.BlockSpec((block_rows, _LANES), lambda i: (i, 0))],
        out_specs=pl.BlockSpec((block_rows, _LANES), lambda i: (i, 0)),
        out_shape=jax.ShapeDtypeStruct((rows, _LANES), dtype),
        compiler_params=pltpu.CompilerParams(
            dimension_semantics=("parallel",),
            vmem_limit_bytes=_VMEM_LIMIT_BYTES,
        ),
        cost_estimate=cost,
    )(x2d)

    out_flat = out2d.reshape(-1)
    if padded:
        out_flat = out_flat[:n]
    return out_flat.reshape(orig_shape)


def _reference(x):
    return x * 0.5 * (1.0 + jax.lax.erf(x / math.sqrt(2.0)))


if __name__ == "__main__":
    # Primary test: f32, NCHW activation-like shape (batch=2, channels=4, 16x16).
    x = jax.random.normal(jax.random.PRNGKey(0), (2, 4, 16, 16), jnp.float32)
    out = jax.block_until_ready(gelu(x))
    assert out.shape == x.shape and out.dtype == x.dtype
    np.testing.assert_allclose(np.asarray(out), np.asarray(_reference(x)),
                               atol=1e-5, rtol=1e-5)

    # Ragged path: n % 128 != 0 exercises the pad branch + masked edge block.
    x2 = jax.random.normal(jax.random.PRNGKey(1), (5, 7, 31), jnp.float32)
    out2 = jax.block_until_ready(gelu(x2))
    np.testing.assert_allclose(np.asarray(out2), np.asarray(_reference(x2)),
                               atol=1e-5, rtol=1e-5)

    # bf16 HBM I/O with f32 in-kernel compute (halves bandwidth on v6e/v7x).
    x3 = jax.random.normal(jax.random.PRNGKey(2), (2, 4, 16, 16), jnp.bfloat16)
    out3 = jax.block_until_ready(gelu(x3))
    assert out3.dtype == jnp.bfloat16
    ref3 = _reference(x3.astype(jnp.float32)).astype(jnp.bfloat16)
    np.testing.assert_allclose(np.asarray(out3.astype(jnp.float32)),
                               np.asarray(ref3.astype(jnp.float32)),
                               atol=1e-2, rtol=1e-2)

    print("KERNEL_OK")
</pallas_src>

<mosaic_0001>
module attributes {stable_mosaic.version = 11 : i64} {
  func.func @_gelu_kernel(%arg0: i32, %arg1: memref<8x128xf32, #tpu.memory_space<vmem>>, %arg2: memref<8x128xf32, #tpu.memory_space<vmem>>) attributes {dimension_semantics = [#tpu.dimension_semantics<parallel>], iteration_bounds = array<i64: 2>, scalar_prefetch = 0 : i64, scratch_operands = 0 : i64, tpu.core_type = #tpu.core_type<tc>, window_params = [{transform_indices = @transform_0, window_bounds = array<i64: 8, 128>}, {transform_indices = @transform_1, window_bounds = array<i64: 8, 128>}]} {
    %c0 = arith.constant 0 : index
    %c0_0 = arith.constant 0 : index
    %0 = vector.load %arg1[%c0, %c0_0] : memref<8x128xf32, #tpu.memory_space<vmem>>, vector<8x128xf32>
    %cst = arith.constant 5.000000e-01 : f32
    %1 = vector.broadcast %cst : f32 to vector<8x128xf32>
    %2 = arith.mulf %0, %1 : vector<8x128xf32>
    %cst_1 = arith.constant 0.707106769 : f32
    %3 = vector.broadcast %cst_1 : f32 to vector<8x128xf32>
    %4 = arith.mulf %0, %3 : vector<8x128xf32>
    %5 = math.erf %4 : vector<8x128xf32>
    %6 = arith.mulf %2, %5 : vector<8x128xf32>
    %7 = arith.addf %2, %6 : vector<8x128xf32>
    %c0_2 = arith.constant 0 : index
    %c0_3 = arith.constant 0 : index
    %8 = vector.load %arg2[%c0_2, %c0_3] : memref<8x128xf32, #tpu.memory_space<vmem>>, vector<8x128xf32>
    tpu.vector_store %arg2[%c0_2, %c0_3], %7 {strides = array<i32>} : memref<8x128xf32, #tpu.memory_space<vmem>>, vector<8x128xf32>,
    return
  }
  func.func @transform_0(%arg0: i32) -> (i32, i32) {
    %c0_i32 = arith.constant 0 : i32
    %c0_i32_0 = arith.constant 0 : i32
    return %arg0, %c0_i32 : i32, i32
  }
  func.func @transform_1(%arg0: i32) -> (i32, i32) {
    %c0_i32 = arith.constant 0 : i32
    %c0_i32_0 = arith.constant 0 : i32
    return %arg0, %c0_i32 : i32, i32
  }
}

</mosaic_0001>

<bundles_post_ra>
// kernel: tpu_custom_call.1
= control target key start
LH: loop header
LB: loop body
LE: loop exit
PB: predicated region body
PF: predicated region fallthrough
CT: control target
= control target key end

     0   :  { %6 = vsyncpa [#allocation3], 0  ;;  %s566_s0 = inlined_call_operand.hbm [shape: f32[16,128], index: 0, kind: input, shape index: {}]   ;;  %s567_s1 = inlined_call_operand.hbm [shape: f32[16,128], index: 1, kind: output, shape index: {}]  }
   0x1   :  { %8 = vsyncpa [#allocation3 + $0x1], 0 }
   0x2   :  { %9 = vsyncpa [#allocation4], 0 }
   0x3   :  { %11 = vsyncpa [#allocation4 + $0x1], 0  ;;  %s435_s6 = smov 0   ;;  %s437_s7 = smov 0  }
   0x4   :  { %s439_s8 = smov 0   ;;  %s441_s9 = smov 0  }
   0x5 LB: > { %s456_s10 = sadd.s32 4294967295, %s423_s9   ;;  %s266_s11 = sadd.s32 4294967294, %s423_s9   ;;  %s423_s9 = sphi %s441_s9, %s577_s9   ;;  %s419_s8 = sphi %s439_s8, %s576_s8   ;;  %s415_s7 = sphi %s437_s7, %s575_s7   ;;  %s411_s6 = sphi %s435_s6, %s574_s6  }
   0x6   : > { %s460_s12 = sadd.s32 1, %s423_s9   ;;  %s24_s13 = sadd.s32 1, %s419_s8 }
   0x7   : > { %s21_s14 = ssub.s32 %s423_s9, %s460_s12  ;;  %p31_p0 = scmp.ne.s32.totalorder %s419_s8, %s415_s7 }
   0x8   : > { %p22_p1 = scmp.eq.s32.totalorder %s21_s14, 0  ;;  %p32_p2 = scmp.eq.s32.totalorder %s423_s9, 0 }
   0x9   : > { %p37_p3 = scmp.ne.s32.totalorder %s415_s7, %s411_s6  ;;  %p38_p4 = scmp.eq.s32.totalorder %s456_s10, 0 }
   0xa   : > { %s472_s15 = scalar_select %p22_p1, %s419_s8, %s24_s13  }
   0xb   : > { %p474_p5 = por %p32_p2, %p31_p0  ;;  %p478_p6 = por %p38_p4, %p37_p3 }
   0xc   : > { %p61_p7 = scmp.eq.s32.totalorder %s456_s10, 1  ;;  %p67_p8 = scmp.eq.s32.totalorder %s266_s11, 1 }
   0xd   : > { %p291_p10 = scmp.lt.s32.totalorder %s423_s9, 2  ;;  %s87_s20 = sand.u32 1, %s419_s8  }
   0xe   : > { %p485_p11 = por %p61_p7, %p31_p0  ;;  %p489_p12 = por %p67_p8, %p37_p3 }
   0xf   : > { %s270_s21 = sshll.u32 %s423_s9, 3  ;;  %s269_s22 = sshll.u32 %s87_s20, 3 }
  0x10   : > { %s95_s25 = scalar_lea.hbm %s566_s0, %s270_s21  ;;  %s91_s27 = scalar_lea.vmem [#allocation2], %s269_s22 }
  0x11   : > { %s97_s26 = sshll.u32 %s95_s25, 4  ;;  %s99_s28 = sshll.u32 %s91_s27, 4  ;;  %s98_s26 = int_to_ptr.hbm [resolvable:$true] %s97_s26  ;;  %s100_s28 = int_to_ptr.vmem [resolvable:$true] %s99_s28 }
  0x12   : > { %p500_p13 = pnand %p291_p10, %p474_p5  ;;  %p271_p0 = scmp.ge.s32.totalorder %s423_s9, 1 }
  0x13   : > { %p104_p1 = scmp.lt.s32.totalorder %s423_s9, 3  ;;  %s88_s30 = scalar_lea.sflag [#allocation3], %s87_s20 }
  0x14   : > { %s327_s2 = sshra.s32 %s98_s26, 4  ;;  %p331_p3 = pneg %p500_p13  ;;  %s328_s2 = int_to_ptr.hbm [resolvable:$true] %s327_s2 }
  0x15   : > { %s329_s3 = scalar_lea.hbm %s328_s2, 8  ;;  %s334_s11 = scalar_lea.hbm %s566_s0, 16 }
  0x16   : > { %p330_p2 = scmp.ne.s32.totalorder %s328_s2, %s329_s3  ;;  %p335_p5 = scmp.lt.s32.totalorder %s328_s2, %s566_s0 }
  0x17   : > { %p336_p8 = scmp.lt.s32.totalorder %s334_s11, %s329_s3 }
  0x18   : > { %p332_p4 = pnand %p331_p3, %p330_p2 }
  0x19   : > { %p337_p10 = por %p336_p8, %p335_p5 }
  0x1a   : > { %p333_p7 = pneg %p332_p4 }
  0x1c   : > { %p338_p9 = pnand %p337_p10, %p333_p7 }
  0x1e   : > { %341 = shalt.err (!%p338_p9)
}
  0x1f   : > { %286 = dma.hbm_to_vmem [thread:$0]  (!%p500_p13), %s98_s26, 128, %s100_s28, %s88_s30  }
  0x20   : > { %p105_p2 = pnand %p271_p0, %p104_p1 }
  0x21   : > { %s521_s16 = sand.u32 (!%p105_p2), 1, %s415_s7  }
  0x22   : > { %108 = sbr.rel (%p105_p2) target bundleno = 95 (0x5f), region = 24  ;;  %s272_s20 = sshll.u32 (!%p105_p2), %s521_s16, 3 }
  0x23   : > { %s111_s21 = scalar_lea.sflag (!%p105_p2), [#allocation3], %s521_s16  ;;  %s114_s22 = scalar_lea.vmem (!%p105_p2), [#allocation2], %s272_s20 }
  0x27   : > { %402 = dma.done.wait (%p478_p6), %s111_s21, 128  }
  0x28   : > { %404 = vsyncadd (%p478_p6), %s111_s21, 4294967168  ;;  %v134_v0 = vld [vmem:[%s114_s22] sm:$0xff]  ;;  %s276_s17 = sshll.u32 %s456_s10, 3  ;;  %s133_s26 = scalar_lea.vmem [#allocation5], %s272_s20 }
  0x29   : > { %v136_v1 = vmul.f32 0.70710677, %v134_v0  ;;  %v135_v35 = vmul.f32 0.5, %v134_v0  ;;  %s191_s25 = scalar_lea.hbm %s567_s1, %s276_s17  ;;  %s193_s27 = sshll.u32 %s133_s26, 4  ;;  %s194_s27 = int_to_ptr.vmem [resolvable:$true] %s193_s27 }
  0x2a   : > { %s195_s28 = sshll.u32 %s191_s25, 4  ;;  %s181_s10 = scalar_lea.sflag [#allocation4], %s521_s16  ;;  %s196_s28 = int_to_ptr.hbm [resolvable:$true] %s195_s28 }
  0x2b   : > { %v137_v2 = vmul.f32 %v136_v1, %v136_v1  ;;  %s371_s29 = sshra.s32 %s196_s28, 4  ;;  %s377_s4 = scalar_lea.hbm %s567_s1, 16  ;;  %s372_s29 = int_to_ptr.hbm [resolvable:$true] %s371_s29 }
  0x2c   : > { %s373_s30 = scalar_lea.hbm %s372_s29, 8  ;;  %p378_p0 = scmp.lt.s32.totalorder %s372_s29, %s567_s1 }
  0x2d   : > { %v138_v3 = vmin.f32 %v137_v2, 16.0  ;;  %p374_p6 = scmp.ne.s32.totalorder %s372_s29, %s373_s30  ;;  %p379_p1 = scmp.lt.s32.totalorder %s377_s4, %s373_s30 }
  0x2f   : > { %v139_v4 = vmul.f32 2.1237322e-06, %v138_v3  ;;  %v150_v5 = vmul.f32 3.8918573e-05, %v138_v3  ;;  %p375_p9 = pnand %p374_p6, %p485_p11  ;;  %p380_p3 = por %p379_p1, %p378_p0 }
  0x31   : > { %v140_v6 = vadd.f32 0.00028619796, %v139_v4  ;;  %v151_v7 = vadd.f32 0.001143296, %v150_v5  ;;  %p376_p13 = pneg %p375_p9 }
  0x33   : > { %v141_v8 = vmul.f32 %v140_v6, %v138_v3  ;;  %v152_v9 = vmul.f32 %v151_v7, %v138_v3  ;;  %p381_p4 = pnand %p380_p3, %p376_p13 }
  0x35   : > { %v142_v10 = vadd.f32 0.0036580483, %v141_v8  ;;  %v153_v11 = vadd.f32 0.014752088, %v152_v9 }
  0x37   : > { %v143_v12 = vmul.f32 %v142_v10, %v138_v3  ;;  %v154_v13 = vmul.f32 %v153_v11, %v138_v3 }
  0x39   : > { %v155_v14 = vadd.f32 0.112945676, %v154_v13  ;;  %v144_v15 = vadd.f32 0.05243302, %v143_v12 }
  0x3b   : > { %v156_v16 = vmul.f32 %v155_v14, %v138_v3  ;;  %v145_v18 = vmul.f32 %v144_v15, %v138_v3 }
  0x3d   : > { %v157_v17 = vadd.f32 0.4994258, %v156_v16  ;;  %v146_v21 = vadd.f32 0.18741608, %v145_v18 }
  0x3f   : > { %v158_v19 = vmul.f32 %v157_v17, %v138_v3  ;;  %v147_v22 = vmul.f32 %v146_v21, %v138_v3 }
  0x41   : > { %v159_v20 = vadd.f32 1.0, %v158_v19  ;;  %v148_v25 = vadd.f32 1.1283791, %v147_v22 }
  0x43   : > { %325 = vrcp.f32 %v159_v20  ;;  %v171_v26 = vand.u32 2147483648, %v159_v20  ;;  %vm165_vm0 = vweird.f32 %v159_v20  ;;  %v169_v28 = vand.u32 2147483647, %v159_v20 }
  0x44   : > { %v149_v31 = vmul.f32 %v148_v25, %v136_v1 }
  0x45   : > { %v172_v30 = vor.u32 1.1754944e-38, %v171_v26  ;;  %vm170_vm3 = vcmp.eq.f32.partialorder %v169_v28, 8.507059e+37 }
  0x49   : > { %v326_v23 = vpop.eup %325 }
  0x4a   : > { %v161_v24 = vmul.f32 %v326_v23, %v159_v20  ;;  %vm166_vm1 = vweird.f32 %v326_v23 }
  0x4b   : > { %vm167_vm2 = vmor %vm165_vm0, %vm166_vm1 }
  0x4c   : > { %v162_v27 = vsub.f32 1.0, %v161_v24 }
  0x4e   : > { %v163_v29 = vmul.f32 %v326_v23, %v162_v27 }
  0x50   : > { %v164_v32 = vadd.f32 %v326_v23, %v163_v29 }
  0x52   : > { %v168_v33 = vsel %vm167_vm2, %v326_v23, %v164_v32 }
  0x53   : > { %v173_v34 = vsel %vm170_vm3, %v172_v30, %v168_v33 }
  0x54   : > { %v174_v36 = vmul.f32 %v173_v34, %v149_v31 }
  0x56   : > { %v274_v37 = vclamps-f32 %v174_v36, 1.0 }
  0x58   : > { %v177_v38 = vmul.f32 %v274_v37, %v135_v35 }
  0x5a   : > { %v178_v39 = vadd.f32 %v177_v38, %v135_v35 }
  0x5c   : > { %179 = vst [vmem:[%s133_s26] sm:$0xff] %v178_v39 }
  0x5d   : > { %384 = shalt.err (!%p381_p4)
}
  0x5e   : > { %281 = dma.vmem_to_hbm [thread:$0]  (%p485_p11), %s194_s27, 128, %s196_s28, %s181_s10  }
  0x5f PF: > { %s207_s13 = sand.u32 1, %s411_s6   ;;  %p573_p7 = scmp.ge.s32.totalorder %s423_s9, 2 }
  0x60   : > { %s208_s14 = scalar_lea.sflag [#allocation4], %s207_s13 }
  0x61   : > { %p288_p5 = pnand %p573_p7, %p489_p12 }
  0x63   : > { %p289_p8 = pneg %p288_p5 }
  0x65   : > { %406 = dma.done.wait (%p289_p8), %s208_s14, 128  }
  0x66   : > { %408 = vsyncadd (%p289_p8), %s208_s14, 4294967168  ;;  %p14_p10 = scmp.ge.s32.totalorder %s460_s12, 4   ;;  %s574_s6 = smov %s415_s7 }
  0x67   : > { %s575_s7 = smov %s419_s8  ;;  %s576_s8 = smov %s472_s15 }
  0x68   : > { %s577_s9 = smov %s460_s12  ;;  %16 = sbr.rel (!%p14_p10) target bundleno = 5 (0x5), region = 69 }
  0x6d   :  { %214 = vsyncpa [#allocation3], 1 }
  0x6e   :  { %216 = vsyncpa [#allocation3 + $0x1], 1 }
  0x6f   :  { %217 = vsyncpa [#allocation4], 1 }
  0x70   :  { %219 = vsyncpa [#allocation4 + $0x1], 1 }

</bundles_post_ra>
